<compile_context>
chip_gen: v7x
topology: tpu7x:2x2x1
jax: 0.10.0
libtpu: 0.0.40
codegen_flags: <defaults>
</compile_context>

<pallas_src>
import numpy as np
import jax
import jax.numpy as jnp
from jax.experimental import pallas as pl
from jax.experimental.pallas import tpu as pltpu


# ----------------------------------------------------------------------------
# Pallas kernel 1: spatial mean  (S_node = feat.mean(2).mean(2))
# Input pre-flattened to (N, C, H*W) -> single lane-dense reduction, f32 acc.
# ----------------------------------------------------------------------------
def _spatial_mean_kernel(x_ref, o_ref):
    x = x_ref[...].astype(jnp.float32)              # (N, C, H*W)
    o_ref[...] = jnp.mean(x, axis=-1).astype(o_ref.dtype)


def spatial_mean_pallas(x_flat):
    N, C, HW = x_flat.shape
    return pl.pallas_call(
        _spatial_mean_kernel,
        out_shape=jax.ShapeDtypeStruct((N, C), x_flat.dtype),
        grid=(1,),
        in_specs=[pl.BlockSpec((N, C, HW), lambda i: (0, 0, 0))],
        out_specs=pl.BlockSpec((N, C), lambda i: (0, 0)),
    )(x_flat)


# ----------------------------------------------------------------------------
# Pallas kernel 2: fused, batched RoIAlignAvg (pool folded into the weights)
# ----------------------------------------------------------------------------
def _roi_align_kernel(fidx_ref, feat_ref, wy_ref, wx_ref, o_ref):
    # fidx_ref : (R,) int32 in SMEM -- only consumed by the index_maps.
    # feat_ref : (1, H, C*W)  frame feature map, C folded into lanes.
    # wy_ref   : (1, P, H)    pool-folded bilinear row weights for this ROI.
    # wx_ref   : (1, P, W)    pool-folded bilinear col weights for this ROI.
    # o_ref    : (1, 1, P*C*P) lane-dense per-ROI output row.
    del fidx_ref
    f = feat_ref[0]                                  # (H, C*W) f32
    wy = wy_ref[0]                                   # (P, H)
    wx = wx_ref[0]                                   # (P, W)
    P, _Hf = wy.shape
    Wf = wx.shape[1]
    C = f.shape[1] // Wf

    # Contraction over H on the MXU: (P, H) @ (H, C*W) -> (P, C*W).
    # TODO(synk): on v6e/v7x the operands could be cast to bf16 (f32 accum) for
    # higher MXU throughput; kept f32 here to match the f32 reference exactly.
    a = jnp.dot(wy, f, preferred_element_type=jnp.float32)           # (P, C*W)

    # Contraction over W on the MXU: (P*C, W) x (P, W)^T -> (P*C, P).
    a2 = a.reshape(P * C, Wf)
    b = jax.lax.dot_general(a2, wx, (((1,), (1,)), ((), ())),
                            preferred_element_type=jnp.float32)      # (P*C, P)

    # Lane-dense store: one wide row per ROI (no masked 7-lane partial stores).
    o_ref[...] = b.reshape(1, 1, P * C * P).astype(o_ref.dtype)


def roi_align_avg_batched(feat_hcw, frame_idx, wy, wx, out_size):
    """One pallas_call for ALL ROIs.

    feat_hcw : (NF, H, C*W) f32 frame features (C in the lane dimension).
    frame_idx: (R,) int32 flat frame index per ROI (frame-contiguous order).
    wy, wx   : (R, P, H) / (R, P, W) pool-folded bilinear weights.
    returns  : (R, C, P, P) f32
    """
    NF, H, CW = feat_hcw.shape
    R, P, _ = wy.shape
    W = wx.shape[2]
    C = CW // W

    out_flat = pl.pallas_call(
        _roi_align_kernel,
        out_shape=jax.ShapeDtypeStruct((R, 1, P * C * P), jnp.float32),
        grid_spec=pltpu.PrefetchScalarGridSpec(
            num_scalar_prefetch=1,
            grid=(R,),
            in_specs=[
                # ROIs are queued frame-contiguously, so this block index only
                # changes at frame boundaries -> feat is not re-fetched per ROI.
                pl.BlockSpec((1, H, CW), lambda r, fidx: (fidx[r], 0, 0)),
                pl.BlockSpec((1, P, H), lambda r, fidx: (r, 0, 0)),
                pl.BlockSpec((1, P, W), lambda r, fidx: (r, 0, 0)),
            ],
            out_specs=pl.BlockSpec((1, 1, P * C * P),
                                   lambda r, fidx: (r, 0, 0)),
        ),
        compiler_params=pltpu.CompilerParams(
            # ROIs are fully independent -> shards across both TCs on v7x
            # (no-op on single-TC v5e / v6e).
            dimension_semantics=("parallel",)),
    )(frame_idx, feat_hcw, wy, wx)

    # (R, 1, P*C*P) -> (R, P, C, P) -> (R, C, P, P)
    return out_flat.reshape(R, P, C, P).transpose(0, 2, 1, 3)


def _pooled_bilinear_weights(start, end, out_size, size):
    """Legacy RoIAlignAvg sampling weights with the 2x2/s1 avg-pool folded in.

    Samples G = out_size+1 points at start + g*(end-start)/out_size (edge
    clamped to [0, size-1]), builds (R, G, size) bilinear one-hot weights and
    folds the trailing average pool: w_pool[p] = 0.5*(w[p] + w[p+1]).
    """
    start = jnp.asarray(start, jnp.float32)
    end = jnp.asarray(end, jnp.float32)
    G = out_size + 1
    bin_sz = (end - start) / float(out_size)
    g = jnp.arange(G, dtype=jnp.float32)
    coord = start[:, None] + g[None, :] * bin_sz[:, None]            # (R, G)
    coord = jnp.clip(coord, 0.0, size - 1.0)                         # edge clamp
    lo = jnp.clip(jnp.floor(coord), 0.0, size - 2.0)
    frac = jnp.clip(coord - lo, 0.0, 1.0)
    lo_i = lo.astype(jnp.int32)
    oh_lo = jax.nn.one_hot(lo_i, size, dtype=jnp.float32)            # (R, G, size)
    oh_hi = jax.nn.one_hot(lo_i + 1, size, dtype=jnp.float32)
    w = (1.0 - frac)[..., None] * oh_lo + frac[..., None] * oh_hi    # (R, G, size)
    return 0.5 * (w[:, :-1, :] + w[:, 1:, :])                        # (R, P, size)


# ----------------------------------------------------------------------------
# Host-side helpers (original source not provided -> plausible implementations)
# ----------------------------------------------------------------------------
def area_sacale_ratio(boxes, im_h, im_w):
    # TODO(synk): original area_sacale_ratio not provided; use box_area / image_area.
    b = np.asarray(boxes, dtype=np.float64)
    return np.round((b[:, 2] - b[:, 0]) * (b[:, 3] - b[:, 1]) / (im_h * im_w), 3)


def H_O_BBOX(H_BOX, O_BOX, Im_H, Im_W):
    # TODO(synk): original H_O_BBOX not provided; union box per (H,O) pair + simple geometry.
    H = np.asarray(H_BOX, dtype=np.float64)
    O = np.asarray(O_BOX, dtype=np.float64)
    rois, geom = [], []
    for h in H:
        for o in O:
            rois.append([min(h[0], o[0]), min(h[1], o[1]),
                         max(h[2], o[2]), max(h[3], o[3]), o[4], o[5]])
            geom.append([(o[0] - h[0]) / Im_W, (o[1] - h[1]) / Im_H,
                         (o[2] - o[0]) / (h[2] - h[0] + 1e-6),
                         (o[3] - o[1]) / (h[3] - h[1] + 1e-6)])
    return rois, geom


def _nm_box(boxes, ratio_W, ratio_H):
    Box = np.insert(np.asarray(boxes, dtype=np.float64)[:, :4], 0, values=0, axis=1)
    return np.round(Box * [1, ratio_W, ratio_H, ratio_W, ratio_H], 3)


# ----------------------------------------------------------------------------
# Module port
# ----------------------------------------------------------------------------
class RoILayerMulityPallas:
    def __init__(self, out_size, in_im_sz):
        self.out_size = out_size
        self.in_img_sz = in_im_sz
        self.spatial_scale = 1.0 / 16.0
        # RoI_layer_mulity has no learnable parameters (RoIAlign is
        # parameter-free), so nothing to initialize.

    def __call__(self, x, bbox_info):
        V, B, C, H, W = x.shape
        NF = V * B
        P = self.out_size

        x_flat = x.reshape(NF, C, H, W)

        # S_node for every (video, box-batch) feature map, one Pallas call.
        s_nodes = spatial_mean_pallas(x_flat.reshape(NF, C, H * W))  # (NF, C)

        # Feature layout for the fused RoIAlign kernel: (NF, H, C*W).
        feat_hcw = jnp.transpose(x_flat, (0, 2, 1, 3)).reshape(NF, H, C * W)

        # ---- pass 1 (host): collect every ROI of every frame -----------------
        nm_chunks, fidx_chunks = [], []
        n_rois = 0
        video_meta = []
        for vd_No, box_info in enumerate(bbox_info):
            frames, im_h, im_w, vid, vd_fn = box_info
            ratio_H = np.round(self.in_img_sz / im_h, 3)
            ratio_W = np.round(self.in_img_sz / im_w, 3)
            per_frame = []
            for bc_No, Box_fm in enumerate(frames):
                H_Box, O_Box, h_num, o_num, fn_No = Box_fm
                fidx = vd_No * B + bc_No
                rec = {"bc_No": bc_No, "fn_No": fn_No, "fidx": fidx,
                       "H_Box": H_Box, "O_Box": O_Box,
                       "h_num": h_num, "o_num": o_num, "slots": {}}
                if h_num > 0:
                    nm = _nm_box(H_Box, ratio_W, ratio_H)
                    rec["slots"]["H"] = (n_rois, nm.shape[0])
                    nm_chunks.append(nm)
                    fidx_chunks.append(np.full((nm.shape[0],), fidx, np.int32))
                    n_rois += nm.shape[0]
                if o_num > 0:
                    nm = _nm_box(O_Box, ratio_W, ratio_H)
                    rec["slots"]["O"] = (n_rois, nm.shape[0])
                    nm_chunks.append(nm)
                    fidx_chunks.append(np.full((nm.shape[0],), fidx, np.int32))
                    n_rois += nm.shape[0]
                    if h_num > 0:
                        H_O_ROI, geometry = H_O_BBOX(H_BOX=H_Box, O_BOX=O_Box,
                                                     Im_H=im_h, Im_W=im_w)
                        rec["H_O_ROI"], rec["geometry"] = H_O_ROI, geometry
                        nm = _nm_box(H_O_ROI, ratio_W, ratio_H)
                        rec["slots"]["HO"] = (n_rois, nm.shape[0])
                        nm_chunks.append(nm)
                        fidx_chunks.append(np.full((nm.shape[0],), fidx, np.int32))
                        n_rois += nm.shape[0]
                per_frame.append(rec)
            video_meta.append((im_h, im_w, vid, vd_fn, per_frame))

        # ---- one fused RoIAlignAvg call for every ROI of every frame ----------
        all_nodes = None
        if n_rois > 0:
            nm_all = np.concatenate(nm_chunks, axis=0).astype(np.float32)  # (R, 5)
            fidx_all = jnp.asarray(np.concatenate(fidx_chunks, axis=0))
            nm = jnp.asarray(nm_all)
            x1 = nm[:, 1] * self.spatial_scale
            y1 = nm[:, 2] * self.spatial_scale
            x2 = nm[:, 3] * self.spatial_scale
            y2 = nm[:, 4] * self.spatial_scale
            wy = _pooled_bilinear_weights(y1, y2, P, H)                    # (R, P, H)
            wx = _pooled_bilinear_weights(x1, x2, P, W)                    # (R, P, W)
            all_nodes = roi_align_avg_batched(feat_hcw, fidx_all, wy, wx, P)

        # ---- pass 2 (host): assemble the original output structure -----------
        batch_out = []
        for vd_No, (im_h, im_w, vid, vd_fn, per_frame) in enumerate(video_meta):
            vd_out = [[im_h, im_w, vid, vd_fn]]
            for rec in per_frame:
                bc_No = rec["bc_No"]
                h_num, o_num = rec["h_num"], rec["o_num"]
                H_Box, O_Box = rec["H_Box"], rec["O_Box"]
                out_key = [True, h_num > 0, o_num > 0, h_num > 0 and o_num > 0]
                out_num = [1, h_num, o_num, h_num * o_num]
                Score = [[0], [], [], []]
                H_area_FM_ratio, O_area_FM_ratio, HO_area_FM_ratio = [], [], []
                Object_cls, geometry = [], []

                Each_bc = x[vd_No, bc_No][None]                       # (1, C, H, W)
                Center_S = Each_bc[:, :, 1:13, 1:13]
                Fake_H_S = Center_S
                S_node = s_nodes[rec["fidx"]][None]                   # (1, C)

                H_Node = O_Node = H_O_Node = None
                if out_key[1]:
                    Score[1] = np.array(H_Box)[:, -2]
                    H_area_FM_ratio = area_sacale_ratio(H_Box, im_h, im_w)
                    off, n = rec["slots"]["H"]
                    H_Node = all_nodes[off:off + n]
                if out_key[2]:
                    Score[2] = np.array(O_Box)[:, -2]
                    O_area_FM_ratio = area_sacale_ratio(O_Box, im_h, im_w)
                    off, n = rec["slots"]["O"]
                    O_Node = all_nodes[off:off + n]
                    Object_cls.append(np.array(O_Box)[:, -1])
                    if out_key[3]:
                        geometry = rec["geometry"]
                        HO_area_FM_ratio = area_sacale_ratio(rec["H_O_ROI"], im_h, im_w)
                        Score[3] = np.array(O_Box)[:, -2]
                        off, n = rec["slots"]["HO"]
                        H_O_Node = all_nodes[off:off + n]

                area_ratio_fm = [H_area_FM_ratio, O_area_FM_ratio,
                                 HO_area_FM_ratio, rec["fn_No"], Object_cls]
                vd_out.append([S_node, H_Node, O_Node, H_O_Node, out_key,
                               out_num, Score, geometry, area_ratio_fm, Fake_H_S])
            batch_out.append(vd_out)
        return batch_out


def _block_all_jax_arrays(obj):
    if isinstance(obj, jax.Array):
        jax.block_until_ready(obj)
    elif isinstance(obj, (list, tuple)):
        for o in obj:
            _block_all_jax_arrays(o)


# ----------------------------------------------------------------------------
# Demo
# ----------------------------------------------------------------------------
if __name__ == "__main__":
    V, B, C, H, W = 2, 2, 32, 14, 14     # 14 = 224 / 16  (feature-map stride 16)
    in_img_sz = 224
    out_size = 7

    key = jax.random.PRNGKey(0)
    x = jax.random.normal(key, (V, B, C, H, W), dtype=jnp.float32)

    # BBox_info: per video -> [frames, im_h, im_w, vid, fn_No]
    # each frame -> (H_Box, O_Box, h_num, o_num, fn_No); boxes are
    # [x1, y1, x2, y2, score, cls] in original image coordinates.
    bbox_info = [
        [
            [
                ([[50., 40., 200., 300., 0.90, 1.],
                  [30., 60., 150., 250., 0.80, 1.]],
                 [[120., 80., 300., 320., 0.70, 5.],
                  [200., 30., 430., 200., 0.60, 7.]],
                 2, 2, 0),
                ([[10., 10., 100., 180., 0.95, 1.]],
                 [], 1, 0, 1),
            ],
            360, 480, 0, 0,
        ],
        [
            [
                ([],
                 [[60., 50., 220., 260., 0.85, 3.]],
                 0, 1, 0),
                ([[20., 30., 140., 200., 0.75, 1.],
                  [150., 60., 280., 310., 0.65, 1.]],
                 [[100., 100., 250., 330., 0.55, 9.]],
                 2, 1, 1),
            ],
            360, 480, 1, 0,
        ],
    ]

    model = RoILayerMulityPallas(out_size=out_size, in_im_sz=in_img_sz)
    batch_out = model(x, bbox_info)
    _block_all_jax_arrays(batch_out)

    # light sanity checks on shapes
    assert batch_out[0][1][0].shape == (1, C)                         # S_node
    assert batch_out[0][1][1].shape == (2, C, out_size, out_size)     # H_Node
    assert batch_out[0][1][2].shape == (2, C, out_size, out_size)     # O_Node
    assert batch_out[0][1][3].shape == (4, C, out_size, out_size)     # H_O_Node
    assert batch_out[0][2][2] is None and batch_out[0][2][3] is None
    assert batch_out[1][1][1] is None
    assert batch_out[0][1][9].shape == (1, C, 12, 12)                 # Fake_H_S

    # S_node must equal a plain mean over (H, W)
    s_ref = np.asarray(x[0, 0]).mean(axis=(1, 2))
    np.testing.assert_allclose(np.asarray(batch_out[0][1][0][0]), s_ref,
                               rtol=1e-5, atol=1e-5)

    print("KERNEL_OK")
</pallas_src>

<mosaic_0001>
module attributes {stable_mosaic.version = 11 : i64} {
  func.func @_spatial_mean_kernel(%arg0: i32, %arg1: memref<4x32x196xf32, #tpu.memory_space<vmem>>, %arg2: memref<4x32xf32, #tpu.memory_space<vmem>>) attributes {dimension_semantics = [#tpu.dimension_semantics<arbitrary>], iteration_bounds = array<i64: 1>, scalar_prefetch = 0 : i64, scratch_operands = 0 : i64, tpu.core_type = #tpu.core_type<tc>, window_params = [{pipeline_mode = #tpu.pipeline_mode<synchronous>, transform_indices = @transform_0, window_bounds = array<i64: 4, 32, 196>}, {pipeline_mode = #tpu.pipeline_mode<synchronous>, transform_indices = @transform_1, window_bounds = array<i64: 4, 32>}]} {
    %c0 = arith.constant 0 : index
    %c0_0 = arith.constant 0 : index
    %c0_1 = arith.constant 0 : index
    %0 = vector.load %arg1[%c0, %c0_0, %c0_1] : memref<4x32x196xf32, #tpu.memory_space<vmem>>, vector<4x32x196xf32>
    %cst = arith.constant dense<0.000000e+00> : vector<4x32xf32>
    %1 = vector.multi_reduction <add>, %0, %cst [2] : vector<4x32x196xf32> to vector<4x32xf32>
    %cst_2 = arith.constant 1.960000e+02 : f32
    %2 = vector.broadcast %cst_2 : f32 to vector<4x32xf32>
    %3 = arith.divf %1, %2 : vector<4x32xf32>
    %c0_3 = arith.constant 0 : index
    %c0_4 = arith.constant 0 : index
    %4 = vector.load %arg2[%c0_3, %c0_4] : memref<4x32xf32, #tpu.memory_space<vmem>>, vector<4x32xf32>
    tpu.vector_store %arg2[%c0_3, %c0_4], %3 {strides = array<i32>} : memref<4x32xf32, #tpu.memory_space<vmem>>, vector<4x32xf32>,
    return
  }
  func.func @transform_0(%arg0: i32) -> (i32, i32, i32) {
    %c0_i32 = arith.constant 0 : i32
    %c0_i32_0 = arith.constant 0 : i32
    %c0_i32_1 = arith.constant 0 : i32
    %c0_i32_2 = arith.constant 0 : i32
    return %c0_i32, %c0_i32_0, %c0_i32_1 : i32, i32, i32
  }
  func.func @transform_1(%arg0: i32) -> (i32, i32) {
    %c0_i32 = arith.constant 0 : i32
    %c0_i32_0 = arith.constant 0 : i32
    %c0_i32_1 = arith.constant 0 : i32
    return %c0_i32, %c0_i32_0 : i32, i32
  }
}

</mosaic_0001>

<bundles_post_ra>
// kernel: tpu_custom_call.1
= control target key start
LH: loop header
LB: loop body
LE: loop exit
PB: predicated region body
PF: predicated region fallthrough
CT: control target
= control target key end

     0   :  { %6 = vsyncpa [#allocation3], 0  ;;  %s380_s0 = inlined_call_operand.hbm [shape: f32[4,32,196], index: 0, kind: input, shape index: {}]   ;;  %s381_s1 = inlined_call_operand.hbm [shape: f32[4,32], index: 1, kind: output, shape index: {}]  }
   0x1   :  { %7 = vsyncpa [#allocation4], 0  ;;  %s313_s6 = smov [#allocation2]   ;;  %s265_s10 = scalar_lea.hbm %s380_s0, 4096 }
   0x2   :  { %s13_s7 = sshll.u32 %s313_s6, 4  ;;  %p266_p0 = scmp.ne.s32.totalorder %s380_s0, %s265_s10  ;;  %s14_s7 = int_to_ptr.vmem [resolvable:$true] %s13_s7 }
   0x3   :  { %p269_p1 = scmp.lt.u32.totalorder %s265_s10, %s380_s0 }
   0x5   :  { %p271_p2 = pnand %p269_p1, %p266_p0 }
   0x7   :  { %274 = shalt.err (!%p271_p2)
}
   0x8   :  { %s275_s15 = scalar_lea.vmem %s14_s7, 4096  ;;  %p280_p4 = scmp.lt.s32.totalorder %s14_s7, %s14_s7 }
   0x9   :  { %p276_p3 = scmp.ne.s32.totalorder %s14_s7, %s275_s15  ;;  %p281_p5 = scmp.lt.s32.totalorder %s275_s15, %s275_s15 }
   0xb   :  { %p282_p6 = por %p281_p5, %p280_p4 }
   0xd   :  { %p283_p7 = pnand %p282_p6, %p276_p3 }
   0xf   :  { %286 = shalt.err (!%p283_p7)
}
  0x10   :  { %s314_s16 = smov 256   ;;  %s315_s17 = smov 16  }
  0x11   :  { %19 = dma.hbm_to_vmem [thread:$0]  %s380_s0, 4096, %s14_s7, [#allocation3], %s314_s16, %s314_s16, %s315_s17  }
  0x12   :  { %309 = dma.done.wait [#allocation3], 4096  }
  0x13   :  { %310 = vsyncadd [#allocation3], 4294963200  ;;  %vm55_vm0 = vcmask 556032   ;;  %v31_v0 = vld [vmem:[#allocation2 + $0x40] sm:$0xff]  ;;  %v32_v1 = vld [vmem:[#allocation2 + $0x48] sm:$0xff]  ;;  %vm164_vm1 = vcmask 130112  }
  0x14   :  { %v23_v2 = vld [vmem:[#allocation2] sm:$0xff]  ;;  %v72_v3 = vsel %vm55_vm0, %v32_v1, 0.0  ;;  %v24_v4 = vld [vmem:[#allocation2 + $0x8] sm:$0xff]  ;;  %v33_v5 = vld [vmem:[#allocation2 + $0x50] sm:$0xff]  ;;  %vm171_vm2 = vcmask 195712   ;;  %vm178_vm3 = vcmask 261312  }
  0x15   :  { %v34_v6 = vld [vmem:[#allocation2 + $0x58] sm:$0xff]  ;;  %v73_v7 = vadd.f32 %v72_v3, %v31_v0  ;;  %v56_v8 = vsel %vm55_vm0, %v24_v4, 0.0  ;;  %v25_v10 = vld [vmem:[#allocation2 + $0x10] sm:$0xff]  ;;  %v36_v14 = vld [vmem:[#allocation2 + $0x68] sm:$0xff]  ;;  %vm237_vm4 = vcmask 1041409   ;;  %vm239_vm5 = vcmask 1042434  }
  0x16   :  { %v76_v9 = vsel %vm55_vm0, %v34_v6, 0.0  ;;  %v26_v11 = vld [vmem:[#allocation2 + $0x18] sm:$0xff]  ;;  %v57_v12 = vadd.f32 %v56_v8, %v23_v2  ;;  %v28_v15 = vld [vmem:[#allocation2 + $0x28] sm:$0xff]  ;;  %v35_v18 = vld [vmem:[#allocation2 + $0x60] sm:$0xff]  ;;  %v80_v19 = vsel %vm55_vm0, %v36_v14, 0.0  ;;  %v153_v6 = vlaneseq  ;;  %s316_s0 = smov [#allocation5]  }
  0x17   :  { %v60_v13 = vsel %vm55_vm0, %v26_v11, 0.0  ;;  %74 = vadd.xlane.f32.xlu1 %v73_v7  ;;  %v77_v16 = vadd.f32 %v76_v9, %v33_v5  ;;  %v27_v20 = vld [vmem:[#allocation2 + $0x20] sm:$0xff]  ;;  %v64_v21 = vsel %vm55_vm0, %v28_v15, 0.0  ;;  %v42_v22 = vld [vmem:[#allocation2 + $0x98] sm:$0xff]  ;;  %v40_v23 = vld [vmem:[#allocation2 + $0x88] sm:$0xff]  ;;  %v81_v24 = vadd.f32 %v80_v19, %v35_v18  ;;  %s252_s20 = sshll.u32 %s316_s0, 4  ;;  %s253_s20 = int_to_ptr.vmem [resolvable:$true] %s252_s20 }
  0x18   :  { %58 = vadd.xlane.f32.xlu0 %v57_v12  ;;  %v61_v17 = vadd.f32 %v60_v13, %v25_v10  ;;  %v65_v25 = vadd.f32 %v64_v21, %v27_v20  ;;  %v41_v26 = vld [vmem:[#allocation2 + $0x90] sm:$0xff]  ;;  %v92_v27 = vsel %vm55_vm0, %v42_v22, 0.0  ;;  %v39_v28 = vld [vmem:[#allocation2 + $0x80] sm:$0xff]  ;;  %v88_v29 = vsel %vm55_vm0, %v40_v23, 0.0  ;;  %v38_v30 = vld [vmem:[#allocation2 + $0x78] sm:$0xff]  ;;  %s287_s21 = scalar_lea.vmem %s253_s20, 64  ;;  %p292_p9 = scmp.lt.s32.totalorder %s253_s20, %s253_s20 }
  0x19   :  { %v30_v31 = vld [vmem:[#allocation2 + $0x38] sm:$0xff]  ;;  %v93_v32 = vadd.f32 %v92_v27, %v41_v26  ;;  %v89_v33 = vadd.f32 %v88_v29, %v39_v28  ;;  %v37_v34 = vld [vmem:[#allocation2 + $0x70] sm:$0xff]  ;;  %v84_v35 = vsel %vm55_vm0, %v38_v30, 0.0  ;;  %v48_v38 = vld [vmem:[#allocation2 + $0xc8] sm:$0xff]  ;;  %v154_v9 = vand.u32 127, %v153_v6  ;;  %p288_p8 = scmp.ne.s32.totalorder %s253_s20, %s287_s21  ;;  %p293_p10 = scmp.lt.s32.totalorder %s287_s21, %s287_s21 }
  0x1a   :  { %v29_v36 = vld [vmem:[#allocation2 + $0x30] sm:$0xff]  ;;  %v68_v37 = vsel %vm55_vm0, %v30_v31, 0.0  ;;  %v44_v39 = vld [vmem:[#allocation2 + $0xa8] sm:$0xff]  ;;  %v85_v40 = vadd.f32 %v84_v35, %v37_v34  ;;  %v47_v42 = vld [vmem:[#allocation2 + $0xc0] sm:$0xff]  ;;  %v104_v43 = vsel %vm55_vm0, %v48_v38, 0.0  ;;  %v156_v10 = vshrl.u32 %v153_v6, 7 }
  0x1b   :  { %78 = vadd.xlane.f32.xlu1 %v77_v16  ;;  %v69_v41 = vadd.f32 %v68_v37, %v29_v36  ;;  %v43_v44 = vld [vmem:[#allocation2 + $0xa0] sm:$0xff]  ;;  %v96_v45 = vsel %vm55_vm0, %v44_v39, 0.0  ;;  %v46_v46 = vld [vmem:[#allocation2 + $0xb8] sm:$0xff]  ;;  %v105_v48 = vadd.f32 %v104_v43, %v47_v42  ;;  %v45_v50 = vld [vmem:[#allocation2 + $0xb0] sm:$0xff]  ;;  %v159_v11 = vadd.s32 4294967288, %v154_v9  ;;  %p294_p11 = por %p293_p10, %p292_p9 }
  0x1c   :  { %62 = vadd.xlane.f32.xlu0 %v61_v17  ;;  %v50_v47 = vld [vmem:[#allocation2 + $0xd8] sm:$0xff]  ;;  %v97_v49 = vadd.f32 %v96_v45, %v43_v44  ;;  %v100_v51 = vsel %vm55_vm0, %v46_v46, 0.0  ;;  %v49_v52 = vld [vmem:[#allocation2 + $0xd0] sm:$0xff]  ;;  %v52_v55 = vld [vmem:[#allocation2 + $0xe8] sm:$0xff]  ;;  %v166_v13 = vadd.s32 4294967280, %v154_v9  ;;  %v173_v15 = vadd.s32 4294967272, %v154_v9 }
  0x1d   :  { %v108_v53 = vsel %vm55_vm0, %v50_v47, 0.0  ;;  %v54_v54 = vld [vmem:[#allocation2 + $0xf8] sm:$0xff]  ;;  %v101_v56 = vadd.f32 %v100_v51, %v45_v50  ;;  %v53_v58 = vld [vmem:[#allocation2 + $0xf0] sm:$0xff]  ;;  %v51_v60 = vld [vmem:[#allocation2 + $0xe0] sm:$0xff]  ;;  %v112_v61 = vsel %vm55_vm0, %v52_v55, 0.0  ;;  %v157_v16 = vsub.s32 %v154_v9, %v156_v10  ;;  %p295_p12 = pnand %p294_p11, %p288_p8 }
  0x1e   :  { %v109_v57 = vadd.f32 %v108_v53, %v49_v52  ;;  %v116_v59 = vsel %vm55_vm0, %v54_v54, 0.0  ;;  %v113_v63 = vadd.f32 %v112_v61, %v51_v60  ;;  %v162_v18 = vsub.s32 %v159_v11, %v156_v10 }
  0x1f   :  { %82 = vadd.xlane.f32.xlu1 %v81_v24  ;;  %v117_v62 = vadd.f32 %v116_v59, %v53_v58  ;;  %v169_v22 = vsub.s32 %v166_v13, %v156_v10  ;;  %v176_v28 = vsub.s32 %v173_v15, %v156_v10  ;;  %vm241_vm6 = vcmask 1043459  }
  0x20   :  { %66 = vadd.xlane.f32.xlu0 %v65_v25  ;;  %vm244_vm7 = vcmask 257024  }
  0x23   :  { %94 = vadd.xlane.f32.xlu1 %v93_v32 }
  0x24   :  { %90 = vadd.xlane.f32.xlu0 %v89_v33 }
  0x27   :  { %86 = vadd.xlane.f32.xlu1 %v85_v40 }
  0x28   :  { %70 = vadd.xlane.f32.xlu0 %v69_v41 }
  0x2b   :  { %106 = vadd.xlane.f32.xlu1 %v105_v48 }
  0x2c   :  { %98 = vadd.xlane.f32.xlu0 %v97_v49 }
  0x2f   :  { %102 = vadd.xlane.f32.xlu1 %v101_v56 }
  0x30   :  { %110 = vadd.xlane.f32.xlu0 %v109_v57 }
  0x33   :  { %118 = vadd.xlane.f32.xlu1 %v117_v62 }
  0x34   :  { %114 = vadd.xlane.f32.xlu0 %v113_v63 }
  0xa4   :  { %v75_v0 = vpop.xlane.xlu1 %74 }
  0xa5   :  { %v59_v1 = vpop.xlane.xlu0 %58  ;;  %v125_v17 = vmul.f32 0.0051020407, %v75_v0 }
  0xa6   :  { %v121_v30 = vmul.f32 0.0051020407, %v59_v1 }
  0xa7   :  { %v183_v33 = vrot.slane %v125_v17, %v157_v16 }
  0xa8   :  { %v79_v2 = vpop.xlane.xlu1 %78  ;;  %v158_v45 = vrot.slane %v121_v30, %v157_v16 }
  0xa9   :  { %v63_v3 = vpop.xlane.xlu0 %62  ;;  %v126_v19 = vmul.f32 0.0051020407, %v79_v2 }
  0xaa   :  { %v122_v21 = vmul.f32 0.0051020407, %v63_v3 }
  0xab   :  { %v187_v34 = vrot.slane %v126_v19, %v162_v18 }
  0xac   :  { %v83_v4 = vpop.xlane.xlu1 %82  ;;  %v163_v36 = vrot.slane %v122_v21, %v162_v18 }
  0xad   :  { %v67_v5 = vpop.xlane.xlu0 %66  ;;  %v127_v23 = vmul.f32 0.0051020407, %v83_v4  ;;  %v188_v49 = vsel %vm164_vm1, %v187_v34, %v183_v33 }
  0xae   :  { %v123_v24 = vmul.f32 0.0051020407, %v67_v5  ;;  %v165_v52 = vsel %vm164_vm1, %v163_v36, %v158_v45 }
  0xaf   :  { %v192_v37 = vrot.slane %v127_v23, %v169_v22 }
  0xb0   :  { %v95_v7 = vpop.xlane.xlu1 %94  ;;  %v170_v38 = vrot.slane %v123_v24, %v169_v22 }
  0xb1   :  { %v91_v8 = vpop.xlane.xlu0 %90  ;;  %v130_v26 = vmul.f32 0.0051020407, %v95_v7  ;;  %v193_v53 = vsel %vm171_vm2, %v192_v37, %v188_v49 }
  0xb2   :  { %v129_v27 = vmul.f32 0.0051020407, %v91_v8  ;;  %v172_v57 = vsel %vm171_vm2, %v170_v38, %v165_v52 }
  0xb3   :  { %v206_v41 = vrot.slane %v130_v26, %v162_v18 }
  0xb4   :  { %v87_v12 = vpop.xlane.xlu1 %86  ;;  %v202_v42 = vrot.slane %v129_v27, %v157_v16 }
  0xb5   :  { %v71_v14 = vpop.xlane.xlu0 %70  ;;  %v128_v29 = vmul.f32 0.0051020407, %v87_v12 }
  0xb6   :  { %v124_v31 = vmul.f32 0.0051020407, %v71_v14  ;;  %v207_v58 = vsel %vm164_vm1, %v206_v41, %v202_v42 }
  0xb7   :  { %v197_v43 = vrot.slane %v128_v29, %v176_v28 }
  0xb8   :  { %v107_v20 = vpop.xlane.xlu1 %106  ;;  %v177_v46 = vrot.slane %v124_v31, %v176_v28 }
  0xb9   :  { %v99_v25 = vpop.xlane.xlu0 %98  ;;  %v133_v47 = vmul.f32 0.0051020407, %v107_v20  ;;  %v198_v59 = vsel %vm178_vm3, %v197_v43, %v193_v53 }
  0xba   :  { %v131_v32 = vmul.f32 0.0051020407, %v99_v25  ;;  %v179_v61 = vsel %vm178_vm3, %v177_v46, %v172_v57 }
  0xbb   :  { %v221_v62 = vrot.slane %v133_v47, %v157_v16  ;;  %v238_v5 = vsel %vm237_vm4, %v198_v59, %v179_v61 }
  0xbc   :  { %v103_v35 = vpop.xlane.xlu1 %102  ;;  %v211_v48 = vrot.slane %v131_v32, %v169_v22 }
  0xbd   :  { %v132_v39 = vmul.f32 0.0051020407, %v103_v35  ;;  %v111_v40 = vpop.xlane.xlu0 %110 }
  0xbe   :  { %v134_v44 = vmul.f32 0.0051020407, %v111_v40  ;;  %v212_v63 = vsel %vm171_vm2, %v211_v48, %v207_v58 }
  0xbf   :  { %v216_v50 = vrot.slane %v132_v39, %v176_v28 }
  0xc0   :  { %v119_v51 = vpop.xlane.xlu1 %118  ;;  %v225_v54 = vrot.slane %v134_v44, %v162_v18 }
  0xc1   :  { %v115_v55 = vpop.xlane.xlu0 %114  ;;  %v136_v56 = vmul.f32 0.0051020407, %v119_v51  ;;  %v217_v1 = vsel %vm178_vm3, %v216_v50, %v212_v63 }
  0xc2   :  { %v135_v60 = vmul.f32 0.0051020407, %v115_v55  ;;  %v226_v3 = vsel %vm164_vm1, %v225_v54, %v221_v62  ;;  %v240_v7 = vsel %vm239_vm5, %v217_v1, %v238_v5 }
  0xc3   :  { %v235_v0 = vrot.slane %v136_v56, %v176_v28 }
  0xc4   :  { %v230_v2 = vrot.slane %v135_v60, %v169_v22 }
  0xc6   :  { %v231_v4 = vsel %vm171_vm2, %v230_v2, %v226_v3 }
  0xc7   :  { %v236_v6 = vsel %vm178_vm3, %v235_v0, %v231_v4 }
  0xc8   :  { %v242_v8 = vsel %vm241_vm6, %v236_v6, %v240_v7 }
  0xc9   :  { %245 = vst.msk [vmem:[#allocation5] sm:$0xf] %vm244_vm7, %v242_v8 }
  0xca   :  { %298 = shalt.err (!%p295_p12)
}
  0xcb   :  { %s299_s24 = scalar_lea.hbm %s381_s1, 64 }
  0xcc   :  { %p300_p13 = scmp.ne.s32.totalorder %s381_s1, %s299_s24  ;;  %p303_p0 = scmp.lt.u32.totalorder %s299_s24, %s381_s1 }
  0xce   :  { %p305_p1 = pnand %p303_p0, %p300_p13 }
  0xd0   :  { %308 = shalt.err (!%p305_p1)
}
  0xd1   :  { %255 = dma.vmem_to_hbm [thread:$0]  %s253_s20, 64, %s381_s1, [#allocation4]  }
  0xd2   :  { %311 = dma.done.wait [#allocation4], 64  }
  0xd3   :  { %312 = vsyncadd [#allocation4], 4294967232 }
  0xd4   :  { %259 = vsyncpa [#allocation3], 1 }
  0xd5   :  { %260 = vsyncpa [#allocation4], 1 }

</bundles_post_ra>
